<compile_context>
chip_gen: v6e
topology: v6e:2x2x1
jax: 0.10.0
libtpu: 0.0.40
codegen_flags: <defaults>
</compile_context>

<pallas_src>
import jax
import jax.numpy as jnp
from jax.experimental import pallas as pl
from jax.experimental.pallas import tpu as pltpu


def _round_up(n: int, m: int) -> int:
    return ((n + m - 1) // m) * m


def mlp_kernel(x_ref, w1_ref, b1_ref, w2_ref, b2_ref, o_ref):
    # x_ref:  [tb, D_in]   (batch tile, pipelined)
    # w1_ref: [D_in, H]    (resident)   b1_ref: [1, H]
    # w2_ref: [H, O_pad]   (resident)   b2_ref: [1, O_pad]
    # o_ref:  [tb, O_pad]  (lane-dense output tile)
    x = x_ref[...]
    h = jnp.dot(x, w1_ref[...], preferred_element_type=jnp.float32)   # [tb, H]
    h = jnp.maximum(h + b1_ref[...], 0.0)                             # bias + ReLU
    y = jnp.dot(h, w2_ref[...], preferred_element_type=jnp.float32)   # [tb, O_pad]
    o_ref[...] = (y + b2_ref[...]).astype(o_ref.dtype)


def two_layer_nn(x, w1, b1, w2, b2, *, block_b: int = 256):
    """Forward pass of TwoLayerNN.

    x:  [B, D_in]
    w1: [H, D_in], b1: [H]      (PyTorch nn.Linear layout)
    w2: [O, H],    b2: [O]
    returns [B, O]
    """
    B, D_in = x.shape
    H = w1.shape[0]
    O = w2.shape[0]

    # --- Wrapper-side layout plumbing (done once, outside the kernel) ---
    # Pre-transpose weights to [in, out] so the kernel needs no `.T`.
    w1_t = w1.T                                  # [D_in, H]
    w2_t = w2.T                                  # [H, O]

    # Lane-dense output: pad O to a multiple of 128 (unmasked vector stores).
    O_pad = _round_up(max(O, 128), 128)
    if O_pad != O:
        w2_t = jnp.pad(w2_t, ((0, 0), (0, O_pad - O)))
        b2 = jnp.pad(b2, (0, O_pad - O))

    b1_2d = b1.reshape(1, H)
    b2_2d = b2.reshape(1, O_pad)

    # Batch tiling: tb rows per grid step (multiple of 8 sublanes).
    tb = min(block_b, _round_up(B, 8))
    B_pad = _round_up(B, tb)
    if B_pad != B:
        x = jnp.pad(x, ((0, B_pad - B), (0, 0)))
    grid = (B_pad // tb,)

    out = pl.pallas_call(
        mlp_kernel,
        out_shape=jax.ShapeDtypeStruct((B_pad, O_pad), x.dtype),
        grid_spec=pl.GridSpec(
            grid=grid,
            in_specs=[
                pl.BlockSpec((tb, D_in), lambda i: (i, 0)),     # x tile (pipelined)
                pl.BlockSpec((D_in, H), lambda i: (0, 0)),      # w1 (resident)
                pl.BlockSpec((1, H), lambda i: (0, 0)),         # b1 (resident)
                pl.BlockSpec((H, O_pad), lambda i: (0, 0)),     # w2 (resident)
                pl.BlockSpec((1, O_pad), lambda i: (0, 0)),     # b2 (resident)
            ],
            out_specs=pl.BlockSpec((tb, O_pad), lambda i: (i, 0)),
        ),
        compiler_params=pltpu.CompilerParams(
            dimension_semantics=("parallel",)),
    )(x, w1_t, b1_2d, w2_t, b2_2d)

    return out[:B, :O]


if __name__ == "__main__":
    # Deterministic parameter init (synthetic; mimics nn.Linear shapes).
    input_dim, hidden_dim, output_dim = 16, 32, 8
    batch = 8

    key = jax.random.PRNGKey(0)
    kx, k1, k2, k3, k4 = jax.random.split(key, 5)

    x = jax.random.normal(kx, (batch, input_dim), dtype=jnp.float32)

    # nn.Linear(in, out): weight [out, in], bias [out].
    lim1 = 1.0 / (input_dim ** 0.5)
    w1 = jax.random.uniform(k1, (hidden_dim, input_dim), jnp.float32, -lim1, lim1)
    b1 = jax.random.uniform(k2, (hidden_dim,), jnp.float32, -lim1, lim1)
    lim2 = 1.0 / (hidden_dim ** 0.5)
    w2 = jax.random.uniform(k3, (output_dim, hidden_dim), jnp.float32, -lim2, lim2)
    b2 = jax.random.uniform(k4, (output_dim,), jnp.float32, -lim2, lim2)

    out = two_layer_nn(x, w1, b1, w2, b2)
    jax.block_until_ready(out)

    # Reference check against plain JAX.
    ref = jnp.maximum(x @ w1.T + b1, 0.0) @ w2.T + b2
    assert out.shape == (batch, output_dim)
    assert jnp.allclose(out, ref, atol=1e-5, rtol=1e-5)

    print("KERNEL_OK")
</pallas_src>

<mosaic_0001>
module attributes {stable_mosaic.version = 11 : i64} {
  func.func @mlp_kernel(%arg0: i32, %arg1: memref<8x16xf32, #tpu.memory_space<vmem>>, %arg2: memref<16x32xf32, #tpu.memory_space<vmem>>, %arg3: memref<1x32xf32, #tpu.memory_space<vmem>>, %arg4: memref<32x128xf32, #tpu.memory_space<vmem>>, %arg5: memref<1x128xf32, #tpu.memory_space<vmem>>, %arg6: memref<8x128xf32, #tpu.memory_space<vmem>>) attributes {dimension_semantics = [#tpu.dimension_semantics<parallel>], iteration_bounds = array<i64: 1>, scalar_prefetch = 0 : i64, scratch_operands = 0 : i64, tpu.core_type = #tpu.core_type<tc>, window_params = [{transform_indices = @transform_0, window_bounds = array<i64: 8, 16>}, {pipeline_mode = #tpu.pipeline_mode<synchronous>, transform_indices = @transform_1, window_bounds = array<i64: 16, 32>}, {pipeline_mode = #tpu.pipeline_mode<synchronous>, transform_indices = @transform_2, window_bounds = array<i64: 1, 32>}, {pipeline_mode = #tpu.pipeline_mode<synchronous>, transform_indices = @transform_3, window_bounds = array<i64: 32, 128>}, {pipeline_mode = #tpu.pipeline_mode<synchronous>, transform_indices = @transform_4, window_bounds = array<i64: 1, 128>}, {transform_indices = @transform_5, window_bounds = array<i64: 8, 128>}]} {
    %c0 = arith.constant 0 : index
    %c0_0 = arith.constant 0 : index
    %0 = vector.load %arg1[%c0, %c0_0] : memref<8x16xf32, #tpu.memory_space<vmem>>, vector<8x16xf32>
    %c0_1 = arith.constant 0 : index
    %c0_2 = arith.constant 0 : index
    %1 = vector.load %arg2[%c0_1, %c0_2] : memref<16x32xf32, #tpu.memory_space<vmem>>, vector<16x32xf32>
    %cst = arith.constant dense<0.000000e+00> : vector<8x32xf32>
    %2 = tpu.matmul %0, %1, %cst {dimension_numbers = #tpu.dot_dimension_numbers<[1], [0], [0], [1], [0, 0, 1, 1], [], []>} : vector<8x16xf32>, vector<16x32xf32>, vector<8x32xf32> -> vector<8x32xf32>
    %c0_3 = arith.constant 0 : index
    %c0_4 = arith.constant 0 : index
    %3 = vector.load %arg3[%c0_3, %c0_4] : memref<1x32xf32, #tpu.memory_space<vmem>>, vector<1x32xf32>
    %4 = vector.broadcast %3 : vector<1x32xf32> to vector<8x32xf32>
    %5 = arith.addf %2, %4 : vector<8x32xf32>
    %cst_5 = arith.constant 0.000000e+00 : f32
    %6 = vector.broadcast %cst_5 : f32 to vector<8x32xf32>
    %7 = arith.maximumf %5, %6 : vector<8x32xf32>
    %c0_6 = arith.constant 0 : index
    %c0_7 = arith.constant 0 : index
    %8 = vector.load %arg4[%c0_6, %c0_7] : memref<32x128xf32, #tpu.memory_space<vmem>>, vector<32x128xf32>
    %cst_8 = arith.constant dense<0.000000e+00> : vector<8x128xf32>
    %9 = tpu.matmul %7, %8, %cst_8 {dimension_numbers = #tpu.dot_dimension_numbers<[1], [0], [0], [1], [0, 0, 1, 1], [], []>} : vector<8x32xf32>, vector<32x128xf32>, vector<8x128xf32> -> vector<8x128xf32>
    %c0_9 = arith.constant 0 : index
    %c0_10 = arith.constant 0 : index
    %10 = vector.load %arg5[%c0_9, %c0_10] : memref<1x128xf32, #tpu.memory_space<vmem>>, vector<1x128xf32>
    %11 = vector.broadcast %10 : vector<1x128xf32> to vector<8x128xf32>
    %12 = arith.addf %9, %11 : vector<8x128xf32>
    %c0_11 = arith.constant 0 : index
    %c0_12 = arith.constant 0 : index
    %13 = vector.load %arg6[%c0_11, %c0_12] : memref<8x128xf32, #tpu.memory_space<vmem>>, vector<8x128xf32>
    tpu.vector_store %arg6[%c0_11, %c0_12], %12 {strides = array<i32>} : memref<8x128xf32, #tpu.memory_space<vmem>>, vector<8x128xf32>,
    return
  }
  func.func @transform_0(%arg0: i32) -> (i32, i32) {
    %c0_i32 = arith.constant 0 : i32
    %c0_i32_0 = arith.constant 0 : i32
    return %arg0, %c0_i32 : i32, i32
  }
  func.func @transform_1(%arg0: i32) -> (i32, i32) {
    %c0_i32 = arith.constant 0 : i32
    %c0_i32_0 = arith.constant 0 : i32
    %c0_i32_1 = arith.constant 0 : i32
    return %c0_i32, %c0_i32_0 : i32, i32
  }
  func.func @transform_2(%arg0: i32) -> (i32, i32) {
    %c0_i32 = arith.constant 0 : i32
    %c0_i32_0 = arith.constant 0 : i32
    %c0_i32_1 = arith.constant 0 : i32
    return %c0_i32, %c0_i32_0 : i32, i32
  }
  func.func @transform_3(%arg0: i32) -> (i32, i32) {
    %c0_i32 = arith.constant 0 : i32
    %c0_i32_0 = arith.constant 0 : i32
    %c0_i32_1 = arith.constant 0 : i32
    return %c0_i32, %c0_i32_0 : i32, i32
  }
  func.func @transform_4(%arg0: i32) -> (i32, i32) {
    %c0_i32 = arith.constant 0 : i32
    %c0_i32_0 = arith.constant 0 : i32
    %c0_i32_1 = arith.constant 0 : i32
    return %c0_i32, %c0_i32_0 : i32, i32
  }
  func.func @transform_5(%arg0: i32) -> (i32, i32) {
    %c0_i32 = arith.constant 0 : i32
    %c0_i32_0 = arith.constant 0 : i32
    return %arg0, %c0_i32 : i32, i32
  }
}

</mosaic_0001>

<bundles_post_ra>
// kernel: tpu_custom_call.1
= control target key start
LH: loop header
LB: loop body
LE: loop exit
PB: predicated region body
PF: predicated region fallthrough
CT: control target
= control target key end

     0   :  { %10 = vsyncpa [#allocation3], 0  ;;  %s427_s0 = inlined_call_operand.hbm [shape: f32[8,16], index: 0, kind: input, shape index: {}]   ;;  %s428_s1 = inlined_call_operand.hbm [shape: f32[16,32], index: 1, kind: input, shape index: {}]   ;;  %s429_s2 = inlined_call_operand.vmem [shape: f32[1,32], index: 2, kind: input, shape index: {}]   ;;  %s430_s3 = inlined_call_operand.hbm [shape: f32[32,128], index: 3, kind: input, shape index: {}]   ;;  %s431_s4 = inlined_call_operand.vmem [shape: f32[1,128], index: 4, kind: input, shape index: {}]   ;;  %s432_s5 = inlined_call_operand.hbm [shape: f32[8,128], index: 5, kind: output, shape index: {}]  }
   0x1   :  { %11 = vsyncpa [#allocation6], 0 }
   0x2   :  { %12 = vsyncpa [#allocation4], 0  ;;  %s371_s18 = smov [#allocation5]  }
   0x3   :  { %s28_s19 = sshll.u32 %s371_s18, 4  ;;  %s29_s19 = int_to_ptr.vmem [resolvable:$true] %s28_s19 }
   0x4   :  { %s293_s20 = scalar_lea.vmem %s29_s19, 256  ;;  %p298_p1 = scmp.lt.s32.totalorder %s29_s19, %s29_s19 }
   0x5   :  { %p294_p0 = scmp.ne.s32.totalorder %s29_s19, %s293_s20  ;;  %p299_p2 = scmp.lt.s32.totalorder %s293_s20, %s293_s20 }
   0x7   :  { %p300_p3 = por %p299_p2, %p298_p1 }
   0x9   :  { %p301_p4 = pnand %p300_p3, %p294_p0 }
   0xb   :  { %304 = shalt.err (!%p301_p4)
}
   0xc   :  { %s372_s21 = smov 128   ;;  %s373_s22 = smov 8  }
   0xd   :  { %34 = dma.hbm_to_vmem [thread:$0]  %s428_s1, 256, %s29_s19, [#allocation6], %s372_s21, %s372_s21, %s373_s22  }
   0xe   :  { %s374_s25 = smov [#allocation2]   ;;  %s375_s27 = smov [#allocation7]  }
   0xf   :  { %s19_s26 = sshll.u32 %s374_s25, 4  ;;  %s42_s28 = sshll.u32 %s375_s27, 4  ;;  %s20_s26 = int_to_ptr.vmem [resolvable:$true] %s19_s26  ;;  %s43_s28 = int_to_ptr.vmem [resolvable:$true] %s42_s28 }
  0x10   :  { %s313_s29 = scalar_lea.vmem %s20_s26, 128  ;;  %p318_p6 = scmp.lt.s32.totalorder %s20_s26, %s20_s26 }
  0x11   :  { %p314_p5 = scmp.ne.s32.totalorder %s20_s26, %s313_s29  ;;  %p319_p7 = scmp.lt.s32.totalorder %s313_s29, %s313_s29 }
  0x13   :  { %p320_p8 = por %p319_p7, %p318_p6 }
  0x15   :  { %p321_p9 = pnand %p320_p8, %p314_p5 }
  0x17   :  { %324 = shalt.err (!%p321_p9)
}
  0x18   :  { %22 = dma.hbm_to_vmem [thread:$0]  %s427_s0, 128, %s20_s26, [#allocation3]  }
  0x19   :  { %s333_s7 = scalar_lea.vmem %s43_s28, 512  ;;  %p338_p11 = scmp.lt.s32.totalorder %s43_s28, %s43_s28 }
  0x1a   :  { %p334_p10 = scmp.ne.s32.totalorder %s43_s28, %s333_s7  ;;  %p339_p12 = scmp.lt.s32.totalorder %s333_s7, %s333_s7 }
  0x1c   :  { %p340_p13 = por %p339_p12, %p338_p11 }
  0x1e   :  { %p341_p0 = pnand %p340_p13, %p334_p10 }
  0x20   :  { %344 = shalt.err (!%p341_p0)
}
  0x21   :  { %48 = dma.hbm_to_vmem [thread:$0]  %s430_s3, 512, %s43_s28, [#allocation6], %s372_s21, %s372_s21, %s373_s22  }
  0x22   :  { %365 = dma.done.wait [#allocation3], 128  }
  0x23   :  { %366 = vsyncadd [#allocation3], 4294967168 }
  0x24   :  { %367 = dma.done.wait [#allocation6], 768  }
  0x25   :  { %368 = vsyncadd [#allocation6], 4294966528  ;;  %v376_v0 = vmov 0.0   ;;  %vm377_vm0 = vmmov 0   ;;  %v62_v1 = vld [vmem:[#allocation5 + $0x8] sm:$0xff]  ;;  %v61_v2 = vld [vmem:[#allocation5] sm:$0xff] }
  0x26   :  { %259 = vmatprep.subr.mxu0 %v376_v0  ;;  %263 = vmatprep.mubr.msk.f32.mxu0 %vm377_vm0, %v376_v0  ;;  %v60_v3 = vld [vmem:[#allocation2] sm:$0xff]  ;;  %vm70_vm1 = vcmask 130048   ;;  %v148_v4 = vld [vmem:[#allocation7 + $0x18] sm:$0xff]  ;;  %v147_v5 = vld [vmem:[#allocation7 + $0x10] sm:$0xff]  ;;  %vm156_vm2 = vcmask 261120   ;;  %s378_s11 = smov [#allocation8]  }
  0x27   :  { %266 = vmatprep.subr.mxu1 %v376_v0  ;;  %274 = vmatprep.mubr.msk.f32.mxu1 %vm377_vm0, %v376_v0  ;;  %v146_v6 = vld [vmem:[#allocation7 + $0x8] sm:$0xff]  ;;  %v145_v7 = vld [vmem:[#allocation7] sm:$0xff]  ;;  %s237_s12 = sshll.u32 %s378_s11, 4  ;;  %s238_s12 = int_to_ptr.vmem [resolvable:$true] %s237_s12 }
  0x28   :  { %260 = vmatpush3.msra.mxu0 %v62_v1  ;;  %267 = vmatpush3.msra.mxu1 %v148_v4  ;;  %v247_v8 = vld [vmem:[%s429_s2] ss:$0 sm:$0xff]  ;;  %s345_s13 = scalar_lea.vmem %s238_s12, 128  ;;  %p350_p2 = scmp.lt.s32.totalorder %s238_s12, %s238_s12 }
  0x29   :  { %261 = vmatprep.subr.mxu0 %v376_v0  ;;  %268 = vmatprep.subr.mxu1 %v376_v0  ;;  %v249_v13 = vld [vmem:[%s431_s4] ss:$0 sm:$0xff]  ;;  %p346_p1 = scmp.ne.s32.totalorder %s238_s12, %s345_s13  ;;  %p351_p3 = scmp.lt.s32.totalorder %s345_s13, %s345_s13 }
  0x2a   :  { %262 = vmatpush3.msra.mxu0 %v61_v2  ;;  %269 = vmatpush3.msra.mxu1 %v147_v5 }
  0x2b   :  { %264 = vmatmul.mubr.msk.f32.vlgmr.msra.gmra.mxu0 %vm70_vm1, %v60_v3  ;;  %270 = vmatprep.subr.mxu1 %v376_v0  ;;  %p352_p4 = por %p351_p3, %p350_p2 }
  0x2c   :  { %271 = vmatpush3.msra.mxu1 %v146_v6 }
  0x2d   :  { %272 = vmatprep.subr.mxu1 %v376_v0  ;;  %p353_p5 = pnand %p352_p4, %p346_p1 }
  0x2e   :  { %273 = vmatpush3.msra.mxu1 %v145_v7 }
  0xeb   :  { %v140_v9 = vpop.f32.mrf.mxu0 }
  0xec   :  { %v141_v10 = vadd.f32 %v247_v8, %v140_v9 }
  0xed   :  { %v265_v11 = vpop.f32.mrf.mxu0 }
  0xee   :  { %v144_v12 = vmax.f32 %v141_v10, 0.0 }
  0xf0   :  { %275 = vmatmul.mubr.msk.f32.vlgmr.msra.gmra.mxu1 %vm156_vm2, %v144_v12 }
 0x1b0   :  { %v226_v14 = vpop.f32.mrf.mxu1 }
 0x1b1   :  { %v227_v15 = vadd.f32 %v249_v13, %v226_v14 }
 0x1b2   :  { %v276_v16 = vpop.f32.mrf.mxu1 }
 0x1b3   :  { %230 = vst [vmem:[#allocation8] sm:$0xff] %v227_v15 }
 0x1b4   :  { %356 = shalt.err (!%p353_p5)
}
 0x1b5   :  { %240 = dma.vmem_to_hbm [thread:$0]  %s238_s12, 128, %s432_s5, [#allocation4]  }
 0x1b6   :  { %369 = dma.done.wait [#allocation4], 128  }
 0x1b7   :  { %370 = vsyncadd [#allocation4], 4294967168 }
 0x1b8   :  { %244 = vsyncpa [#allocation3], 1 }
 0x1b9   :  { %245 = vsyncpa [#allocation6], 1 }
 0x1ba   :  { %246 = vsyncpa [#allocation4], 1 }

</bundles_post_ra>
